<compile_context>
chip_gen: v7x
topology: tpu7x:2x2x1
jax: 0.10.0
libtpu: 0.0.40
codegen_flags: <defaults>
</compile_context>

<pallas_src>
import functools

import jax
import jax.numpy as jnp
from jax.experimental import pallas as pl
from jax.experimental.pallas import tpu as pltpu

K_SHARPNESS = 30.0   # module default k=30
_LANE = 128          # TPU lane width
_HEAD_PAD = 128      # fused [pred | thr] head padded to one full lane width


def _round_up(a, b):
    return (a + b - 1) // b * b


def _vmem_capacity_bytes():
    """Physical VMEM per TensorCore; conservative fallback if the query fails."""
    try:
        cap = getattr(pltpu.get_tpu_info(), "vmem_capacity_bytes", None)
        if cap:
            return int(cap)
    except Exception:
        pass
    return 64 * 1024 * 1024          # v7x-sized fallback, safe on every generation


def _plan_tiles(n):
    """Generation-aware tiling plan -> (tm, tk, n_pad, vmem_limit, resident)."""
    cap = _vmem_capacity_bytes()
    budget = (3 * cap) // 4                        # leave compiler headroom
    if cap >= (96 << 20):                          # v5e / v6e class: 128 MiB VMEM
        tm_t, tk_t, dual_core = 4096, 2048, False
    else:                                          # v7x class: 64 MiB per TC, 2 TCs
        tm_t, tk_t, dual_core = 2048, 2048, True
    n128 = _round_up(n, _LANE)
    tm = min(tm_t, n128)
    # v7x: keep >= 2 row tiles on the "parallel" axis so both TensorCores get work.
    if dual_core and n128 > _LANE and _round_up(n, tm) // tm < 2:
        tm = _round_up(tm // 2, _LANE)
    n_pad = _round_up(n, tm)
    # Largest reduction tile (multiple of 128) that divides n_pad and fits tk_t.
    tk = _LANE
    for cand in range(min(tk_t, n_pad) // _LANE, 0, -1):
        if n_pad % (cand * _LANE) == 0:
            tk = cand * _LANE
            break
    side_bytes = n_pad * _HEAD_PAD * 2             # bf16 [n_pad, 128] side operand
    resident = 2 * side_bytes <= budget // 4       # (double-buffered slab) kept modest
    need = (2 * tm * tk * 2                                          # A double-buffer
            + (2 * side_bytes if resident else 2 * tk * _HEAD_PAD * 2)
            + tm * _HEAD_PAD * 4                                     # f32 accumulator
            + 2 * tm * _LANE * 4)                                    # output buffers
    vmem_limit = int(min(budget, max(need + (4 << 20), 32 << 20)))
    return tm, tk, n_pad, vmem_limit, resident


def _side_block(ref, kk, tk, resident):
    """Current [tk, 128] chunk of the side operand (resident slab or streamed tile)."""
    if resident:
        start = pl.multiple_of(kk * tk, _LANE)
        return ref[pl.ds(start, tk), :]
    return ref[...]


# --------------------------------------------------------------------------
# Pass 1:  Y = A_hat @ Z + bb@[Wp|Wt]     (Z = X @ (Wb @ [Wp|Wt]), precomputed)
# --------------------------------------------------------------------------
def _propagate_project_kernel(a_ref, z_ref, yb_ref, y_ref, acc_ref, *, tk, resident):
    kk = pl.program_id(1)

    @pl.when(kk == 0)
    def _():
        acc_ref[...] = jnp.zeros_like(acc_ref)

    acc_ref[...] += jnp.dot(a_ref[...], _side_block(z_ref, kk, tk, resident),
                            preferred_element_type=jnp.float32)

    # NOTE: output block index is independent of kk and only written on the last
    # kk step (revisiting semantics) — keep the grid order (rows, reduction).
    @pl.when(kk == pl.num_programs(1) - 1)
    def _():
        y_ref[...] = (acc_ref[...] + yb_ref[...]).astype(y_ref.dtype)


# --------------------------------------------------------------------------
# Pass 2:  logits = A_hat @ Y + [bp | bt]; sigmoid heads; sharpened boundary;
#          packed lane-dense output cols 0..4 = [1-x, x, 1-p, p, t]
# --------------------------------------------------------------------------
def _propagate_head_kernel(a_ref, y_ref, bh_ref, out_ref, acc_ref, *,
                           tk, resident, k_sharp):
    kk = pl.program_id(1)

    @pl.when(kk == 0)
    def _():
        acc_ref[...] = jnp.zeros_like(acc_ref)

    acc_ref[...] += jnp.dot(a_ref[...], _side_block(y_ref, kk, tk, resident),
                            preferred_element_type=jnp.float32)

    @pl.when(kk == pl.num_programs(1) - 1)
    def _():
        acc = acc_ref[...]                                  # [TM, 128] f32
        p = jax.nn.sigmoid(acc[:, 0:1] + bh_ref[0])         # pred head
        t = jax.nn.sigmoid(acc[:, 1:2] + bh_ref[1])         # thr head
        xdb = jax.nn.sigmoid(k_sharp * (p - t))             # sharpened boundary
        # Zero-fill once, then narrow column stores: avoids five full-width
        # broadcast/where chains while keeping the 128-lane packed output DMA.
        out_ref[...] = jnp.zeros_like(out_ref)
        out_ref[:, 0:1] = 1.0 - xdb
        out_ref[:, 1:2] = xdb
        out_ref[:, 2:3] = 1.0 - p
        out_ref[:, 3:4] = p
        out_ref[:, 4:5] = t


def dbgnn_forward(a_hat, x, wb, bb, wp, bp, wt, bt, *, k=K_SHARPNESS):
    """DBGNN forward. Returns ([1-x, x], [1-p, p], t) for the first N nodes."""
    n, _ = x.shape
    tm, tk, n_pad, vmem_limit, resident = _plan_tiles(n)

    # A_hat: prefer an already padded bf16 [n_pad, n_pad] matrix (built once by
    # build_normalized_adjacency); otherwise pad / cast here.
    if a_hat.shape == (n_pad, n_pad) and a_hat.dtype == jnp.bfloat16:
        a_p = a_hat
    else:
        a_p = jnp.pad(a_hat.astype(jnp.bfloat16),
                      ((0, n_pad - a_hat.shape[0]), (0, n_pad - a_hat.shape[1])))

    # lin-then-propagate with the heads folded into the backbone weight:
    #   feats = A @ (X@Wb) + bb ;  [p|t]_logit = A @ (feats @ [Wp|Wt]) + [bp|bt]
    #   => Y = A @ Z + bb@Wpt  with  Z = X @ (Wb @ Wpt)   (F never enters the kernel)
    hi = jax.lax.Precision.HIGHEST
    wpt = jnp.concatenate([wp, wt], axis=1).astype(jnp.float32)       # [H, 2]
    weff = jnp.dot(wb.astype(jnp.float32), wpt, precision=hi)         # [F, 2]
    z = jnp.dot(x.astype(jnp.float32), weff, precision=hi)            # [N, 2]
    yb = jnp.dot(bb.astype(jnp.float32), wpt, precision=hi)           # [1, 2]

    z_p = jnp.pad(z.astype(jnp.bfloat16), ((0, n_pad - n), (0, _HEAD_PAD - 2)))
    yb_p = jnp.pad(yb, ((0, 0), (0, _HEAD_PAD - 2)))                   # [1, 128] f32
    b_head = jnp.stack([bp.reshape(()), bt.reshape(())]).astype(jnp.float32)

    grid = (n_pad // tm, n_pad // tk)
    cparams = pltpu.CompilerParams(
        dimension_semantics=("parallel", "arbitrary"),
        vmem_limit_bytes=vmem_limit)

    def side_spec():
        if resident:   # loaded once, resident in VMEM, sliced in-kernel by kk
            return pl.BlockSpec((n_pad, _HEAD_PAD), lambda i, kk: (0, 0))
        return pl.BlockSpec((tk, _HEAD_PAD), lambda i, kk: (kk, 0))

    a_bytes = n_pad * n_pad * 2
    side_bytes = n_pad * _HEAD_PAD * 2

    # ---- pass 1: Y = A @ Z + bb@Wpt ----
    y = pl.pallas_call(
        functools.partial(_propagate_project_kernel, tk=tk, resident=resident),
        out_shape=jax.ShapeDtypeStruct((n_pad, _HEAD_PAD), jnp.bfloat16),
        grid_spec=pltpu.PrefetchScalarGridSpec(
            num_scalar_prefetch=0,
            grid=grid,
            in_specs=[
                pl.BlockSpec((tm, tk), lambda i, kk: (i, kk)),        # A_hat tile
                side_spec(),                                          # Z
                pl.BlockSpec((1, _HEAD_PAD), lambda i, kk: (0, 0)),   # bb@Wpt row
            ],
            out_specs=pl.BlockSpec((tm, _HEAD_PAD), lambda i, kk: (i, 0)),
            scratch_shapes=[pltpu.VMEM((tm, _HEAD_PAD), jnp.float32)],
        ),
        compiler_params=cparams,
        cost_estimate=pl.CostEstimate(
            flops=2 * n_pad * n_pad * _HEAD_PAD,
            transcendentals=0,
            bytes_accessed=a_bytes + 2 * side_bytes),
    )(a_p, z_p, yb_p)

    # ---- pass 2: logits = A @ Y + [bp|bt]; sigmoids; packed output ----
    packed = pl.pallas_call(
        functools.partial(_propagate_head_kernel, tk=tk, resident=resident,
                          k_sharp=float(k)),
        out_shape=jax.ShapeDtypeStruct((n_pad, _LANE), jnp.float32),
        grid_spec=pltpu.PrefetchScalarGridSpec(
            num_scalar_prefetch=0,
            grid=grid,
            in_specs=[
                pl.BlockSpec((tm, tk), lambda i, kk: (i, kk)),        # A_hat tile
                side_spec(),                                          # Y
                pl.BlockSpec(memory_space=pltpu.MemorySpace.SMEM),    # [bp, bt]
            ],
            out_specs=pl.BlockSpec((tm, _LANE), lambda i, kk: (i, 0)),
            scratch_shapes=[pltpu.VMEM((tm, _HEAD_PAD), jnp.float32)],
        ),
        compiler_params=cparams,
        cost_estimate=pl.CostEstimate(
            flops=2 * n_pad * n_pad * _HEAD_PAD,
            transcendentals=3 * n_pad,
            bytes_accessed=a_bytes + side_bytes + n_pad * _LANE * 4),
    )(a_p, y, b_head)

    packed = packed[:n]
    return packed[:, 0:2], packed[:, 2:4], packed[:, 4:5]


def build_normalized_adjacency(edge_index, num_nodes, n_pad=None, dtype=jnp.bfloat16):
    """Dense A_hat = D^-1/2 (A + I) D^-1/2 built directly at padded shape in the
    kernel's streaming dtype (single N^2 materialization + one cast)."""
    if n_pad is None:
        n_pad = num_nodes
    src, dst = edge_index
    adj = jnp.zeros((n_pad, n_pad), jnp.float32)
    adj = adj.at[src, dst].set(1.0)
    adj = adj.at[dst, src].set(1.0)                            # undirected
    idx = jnp.arange(n_pad)
    diag = (idx[:, None] == idx[None, :]) & (idx[:, None] < num_nodes)
    adj = jnp.where(diag, 1.0, adj)                            # self-loops, real nodes only
    deg = adj.sum(axis=1)
    d = jax.lax.rsqrt(jnp.maximum(deg, 1e-12))
    d = jnp.where(deg > 0, d, 0.0)
    return (adj * d[:, None] * d[None, :]).astype(dtype)


if __name__ == "__main__":
    key = jax.random.PRNGKey(0)
    N, F, H = 300, 16, 32    # nodes, input features, hidden dim (small test)

    k_x, k_e, k_wb, k_bb, k_wp, k_bp, k_wt, k_bt = jax.random.split(key, 8)

    # node features
    x = jax.random.normal(k_x, (N, F), dtype=jnp.float32)

    # deterministic edge_index: ring graph + a few chords (no self-loops)
    ring_src = jnp.arange(N, dtype=jnp.int32)
    ring_dst = (ring_src + 1) % N
    extra_src = jax.random.randint(k_e, (N // 2,), 0, N, dtype=jnp.int32)
    extra_dst = (extra_src + jnp.arange(N // 2, dtype=jnp.int32) + 3) % N
    edge_index = (jnp.concatenate([ring_src, extra_src]),
                  jnp.concatenate([ring_dst, extra_dst]))

    # build A_hat once, already padded + bf16 (exactly what the kernels stream)
    _, _, n_pad, _, _ = _plan_tiles(N)
    a_hat = build_normalized_adjacency(edge_index, N, n_pad=n_pad)

    # deterministic GCN parameters (Glorot-ish scaling)
    wb = jax.random.normal(k_wb, (F, H), dtype=jnp.float32) / jnp.sqrt(F)
    bb = jax.random.normal(k_bb, (1, H), dtype=jnp.float32) * 0.1
    wp = jax.random.normal(k_wp, (H, 1), dtype=jnp.float32) / jnp.sqrt(H)
    bp = jax.random.normal(k_bp, (1, 1), dtype=jnp.float32) * 0.1
    wt = jax.random.normal(k_wt, (H, 1), dtype=jnp.float32) / jnp.sqrt(H)
    bt = jax.random.normal(k_bt, (1, 1), dtype=jnp.float32) * 0.1

    out_x, out_p, out_t = jax.block_until_ready(
        dbgnn_forward(a_hat, x, wb, bb, wp, bp, wt, bt, k=K_SHARPNESS))

    assert out_x.shape == (N, 2) and out_p.shape == (N, 2) and out_t.shape == (N, 1)

    # ---- reference 1: pure JAX with the SAME bf16 quantization of the streamed
    # operands and f32 accumulation (tight check of the kernel itself).
    hi = jax.lax.Precision.HIGHEST
    bf = lambda z: z.astype(jnp.bfloat16).astype(jnp.float32)
    a_r = a_hat[:N, :N].astype(jnp.float32)                   # bf16-quantized values
    wpt = jnp.concatenate([wp, wt], axis=1)
    z_r = bf(jnp.dot(x, jnp.dot(wb, wpt, precision=hi), precision=hi))
    yb_r = jnp.dot(bb, wpt, precision=hi)
    y_r = bf(jnp.dot(a_r, z_r, precision=hi) + yb_r)
    logit_r = jnp.dot(a_r, y_r, precision=hi)
    p_r = jax.nn.sigmoid(logit_r[:, 0:1] + bp)
    t_r = jax.nn.sigmoid(logit_r[:, 1:2] + bt)
    xdb_r = jax.nn.sigmoid(K_SHARPNESS * (p_r - t_r))

    assert jnp.allclose(out_x, jnp.concatenate([1.0 - xdb_r, xdb_r], -1), atol=2e-3)
    assert jnp.allclose(out_p, jnp.concatenate([1.0 - p_r, p_r], -1), atol=2e-3)
    assert jnp.allclose(out_t, t_r, atol=2e-3)

    # ---- reference 2: pure-f32 module semantics (coarse sanity check; bf16
    # streaming of A perturbs the result only at the ~1e-2 level).
    a_f = build_normalized_adjacency(edge_index, N, n_pad=N, dtype=jnp.float32)
    feats_f = jnp.dot(a_f, jnp.dot(x, wb, precision=hi), precision=hi) + bb
    p_f = jax.nn.sigmoid(jnp.dot(a_f, jnp.dot(feats_f, wp, precision=hi),
                                 precision=hi) + bp)
    t_f = jax.nn.sigmoid(jnp.dot(a_f, jnp.dot(feats_f, wt, precision=hi),
                                 precision=hi) + bt)
    xdb_f = jax.nn.sigmoid(K_SHARPNESS * (p_f - t_f))
    assert jnp.allclose(out_p[:, 1:2], p_f, atol=5e-2)
    assert jnp.allclose(out_t, t_f, atol=5e-2)
    assert jnp.allclose(out_x[:, 1:2], xdb_f, atol=2e-1)

    print("KERNEL_OK")
</pallas_src>

<mosaic_0001>
module attributes {stable_mosaic.version = 11 : i64} {
  func.func @_propagate_project_kernel(%arg0: i32, %arg1: i32, %arg2: memref<256x512xbf16, #tpu.memory_space<vmem>>, %arg3: memref<512x128xbf16, #tpu.memory_space<vmem>>, %arg4: memref<1x128xf32, #tpu.memory_space<vmem>>, %arg5: memref<256x128xbf16, #tpu.memory_space<vmem>>, %arg6: memref<256x128xf32, #tpu.memory_space<vmem>>) attributes {dimension_semantics = [#tpu.dimension_semantics<parallel>, #tpu.dimension_semantics<arbitrary>], iteration_bounds = array<i64: 2, 1>, scalar_prefetch = 0 : i64, scratch_operands = 1 : i64, tpu.core_type = #tpu.core_type<tc>, window_params = [{transform_indices = @transform_0, window_bounds = array<i64: 256, 512>}, {pipeline_mode = #tpu.pipeline_mode<synchronous>, transform_indices = @transform_1, window_bounds = array<i64: 512, 128>}, {pipeline_mode = #tpu.pipeline_mode<synchronous>, transform_indices = @transform_2, window_bounds = array<i64: 1, 128>}, {transform_indices = @transform_3, window_bounds = array<i64: 256, 128>}]} {
    %c0_i32 = arith.constant 0 : i32
    %0 = arith.cmpi eq, %arg1, %c0_i32 : i32
    %1 = arith.extui %0 : i1 to i32
    %c0_i32_0 = arith.constant 0 : i32
    %2 = arith.cmpi ne, %1, %c0_i32_0 : i32
    scf.if %2 {
      %cst_9 = arith.constant 0.000000e+00 : f32
      %15 = vector.broadcast %cst_9 : f32 to vector<256x128xf32>
      %c0_10 = arith.constant 0 : index
      %c0_11 = arith.constant 0 : index
      %16 = vector.load %arg6[%c0_10, %c0_11] : memref<256x128xf32, #tpu.memory_space<vmem>>, vector<256x128xf32>
      tpu.vector_store %arg6[%c0_10, %c0_11], %15 {strides = array<i32>} : memref<256x128xf32, #tpu.memory_space<vmem>>, vector<256x128xf32>,
    } else {
    }
    %c0 = arith.constant 0 : index
    %c0_1 = arith.constant 0 : index
    %3 = vector.load %arg6[%c0, %c0_1] : memref<256x128xf32, #tpu.memory_space<vmem>>, vector<256x128xf32>
    %c0_2 = arith.constant 0 : index
    %c0_3 = arith.constant 0 : index
    %4 = vector.load %arg2[%c0_2, %c0_3] : memref<256x512xbf16, #tpu.memory_space<vmem>>, vector<256x512xbf16>
    %c512_i32 = arith.constant 512 : i32
    %5 = arith.muli %arg1, %c512_i32 : i32
    %6 = tpu.assume_multiple %5, 128 : i32
    %7 = arith.index_cast %6 : i32 to index
    %c0_4 = arith.constant 0 : index
    %8 = vector.load %arg3[%7, %c0_4] : memref<512x128xbf16, #tpu.memory_space<vmem>>, vector<512x128xbf16>
    %cst = arith.constant dense<0.000000e+00> : vector<256x128xf32>
    %9 = tpu.matmul %4, %8, %cst {dimension_numbers = #tpu.dot_dimension_numbers<[1], [0], [0], [1], [0, 0, 1, 1], [], []>} : vector<256x512xbf16>, vector<512x128xbf16>, vector<256x128xf32> -> vector<256x128xf32>
    %10 = arith.addf %3, %9 : vector<256x128xf32>
    %c0_5 = arith.constant 0 : index
    %c0_6 = arith.constant 0 : index
    %11 = vector.load %arg6[%c0_5, %c0_6] : memref<256x128xf32, #tpu.memory_space<vmem>>, vector<256x128xf32>
    tpu.vector_store %arg6[%c0_5, %c0_6], %10 {strides = array<i32>} : memref<256x128xf32, #tpu.memory_space<vmem>>, vector<256x128xf32>,
    %c0_i32_7 = arith.constant 0 : i32
    %12 = arith.cmpi eq, %arg1, %c0_i32_7 : i32
    %13 = arith.extui %12 : i1 to i32
    %c0_i32_8 = arith.constant 0 : i32
    %14 = arith.cmpi ne, %13, %c0_i32_8 : i32
    scf.if %14 {
      %c0_9 = arith.constant 0 : index
      %c0_10 = arith.constant 0 : index
      %15 = vector.load %arg6[%c0_9, %c0_10] : memref<256x128xf32, #tpu.memory_space<vmem>>, vector<256x128xf32>
      %c0_11 = arith.constant 0 : index
      %c0_12 = arith.constant 0 : index
      %16 = vector.load %arg4[%c0_11, %c0_12] : memref<1x128xf32, #tpu.memory_space<vmem>>, vector<1x128xf32>
      %17 = vector.broadcast %16 : vector<1x128xf32> to vector<256x128xf32>
      %18 = arith.addf %15, %17 : vector<256x128xf32>
      %19 = arith.truncf %18 : vector<256x128xf32> to vector<256x128xbf16>
      %c0_13 = arith.constant 0 : index
      %c0_14 = arith.constant 0 : index
      %20 = vector.load %arg5[%c0_13, %c0_14] : memref<256x128xbf16, #tpu.memory_space<vmem>>, vector<256x128xbf16>
      tpu.vector_store %arg5[%c0_13, %c0_14], %19 {strides = array<i32>} : memref<256x128xbf16, #tpu.memory_space<vmem>>, vector<256x128xbf16>,
    } else {
    }
    return
  }
  func.func @transform_0(%arg0: i32, %arg1: i32) -> (i32, i32) {
    %c0_i32 = arith.constant 0 : i32
    return %arg0, %arg1 : i32, i32
  }
  func.func @transform_1(%arg0: i32, %arg1: i32) -> (i32, i32) {
    %c0_i32 = arith.constant 0 : i32
    %c0_i32_0 = arith.constant 0 : i32
    %c0_i32_1 = arith.constant 0 : i32
    return %c0_i32, %c0_i32_0 : i32, i32
  }
  func.func @transform_2(%arg0: i32, %arg1: i32) -> (i32, i32) {
    %c0_i32 = arith.constant 0 : i32
    %c0_i32_0 = arith.constant 0 : i32
    %c0_i32_1 = arith.constant 0 : i32
    return %c0_i32, %c0_i32_0 : i32, i32
  }
  func.func @transform_3(%arg0: i32, %arg1: i32) -> (i32, i32) {
    %c0_i32 = arith.constant 0 : i32
    %c0_i32_0 = arith.constant 0 : i32
    return %arg0, %c0_i32 : i32, i32
  }
}

</mosaic_0001>

<bundles_post_ra>
// kernel: tpu_custom_call.1
= control target key start
LH: loop header
LB: loop body
LE: loop exit
PB: predicated region body
PF: predicated region fallthrough
CT: control target
= control target key end

     0   :  { %8 = vsyncpa [#allocation4], 0  ;;  %s2893_s0 = inlined_call_operand.hbm [shape: bf16[512,512], index: 0, kind: input, shape index: {}]   ;;  %s2894_s1 = inlined_call_operand.hbm [shape: bf16[512,128], index: 1, kind: input, shape index: {}]   ;;  %s2895_s2 = inlined_call_operand.vmem [shape: f32[1,128], index: 2, kind: input, shape index: {}]   ;;  %s2896_s3 = inlined_call_operand.hbm [shape: bf16[512,128], index: 3, kind: output, shape index: {}]  }
   0x1   :  { %10 = vsyncpa [#allocation4 + $0x1], 0 }
   0x2   :  { %11 = vsyncpa [#allocation7], 0 }
   0x3   :  { %12 = vsyncpa [#allocation5], 0 }
   0x4   :  { %14 = vsyncpa [#allocation5 + $0x1], 0  ;;  %s2551_s12 = smov 0   ;;  %s2553_s13 = smov 0  }
   0x5   :  { %s2555_s14 = smov 0   ;;  %s2557_s15 = smov 0  }
   0x6   :  { %s2559_s16 = smov 0   ;;  %s2561_s17 = smov 0  }
   0x7 LB: > { %s1668_s18 = sadd.s32 4294967295, %s2520_s17   ;;  %s1669_s19 = sadd.s32 4294967294, %s2520_s17   ;;  %s2520_s17 = sphi %s2561_s17, %s20_s17   ;;  %s2516_s16 = sphi %s2559_s16, %s2920_s16   ;;  %s2512_s15 = sphi %s2557_s15, %s2919_s15   ;;  %s2508_s14 = sphi %s2555_s14, %s2918_s14   ;;  %s2504_s13 = sphi %s2553_s13, %s2917_s13   ;;  %s2500_s12 = sphi %s2551_s12, %s2916_s12  }
   0x8   : > { %p54_p0 = scmp.ne.s32.totalorder %s2504_s13, %s2500_s12  ;;  %p2585_p1 = scmp.eq.s32.totalorder %s1668_s18, 0 }
   0x9   : > { %p2589_p2 = scmp.eq.s32.totalorder %s1668_s18, 1  ;;  %p126_p3 = scmp.eq.s32.totalorder %s1669_s19, 1 }
   0xa   : > { %s2901_s20 = scalar_select %p2585_p1, 1, 0 }
   0xb   : > { %s2902_s21 = scalar_select %p2589_p2, 1, 0 }
   0xc   : > { %p2595_p4 = por %p2585_p1, %p54_p0  ;;  %p1670_p5 = scmp.ge.s32.totalorder %s2520_s17, 1 }
   0xd   : > { %p2600_p6 = por %p126_p3, %p54_p0  ;;  %p133_p7 = scmp.lt.s32.totalorder %s2520_s17, 3 }
   0xe   : > { %s2903_s22 = scalar_select %p2595_p4, 1, 0 }
   0xf   : > { %s2904_s23 = scalar_select %p2600_p6, 1, 0 }
  0x10   : > { %p2605_p8 = pnand %p1670_p5, %p133_p7  ;;  %s2522_s25 = smov [#allocation6]  }
  0x11   : > { %s145_s26 = sshll.u32 %s2522_s25, 4  ;;  %s32_s28 = sadd.s32 1, %s2516_s16  ;;  %s146_s26 = int_to_ptr.vmem [resolvable:$true] %s145_s26 }
  0x12   : > { %s2905_s24 = scalar_select %p2605_p8, 1, 0 }
  0x13   : > { %p2177_p9 = pneg %p2605_p8  ;;  %s2376_s4 = scalar_lea.hbm %s2894_s1, 4096 }
  0x14   : > { %p2377_p12 = scmp.ne.s32.totalorder %s2894_s1, %s2376_s4  ;;  %p2383_p5 = scmp.lt.u32.totalorder %s2376_s4, %s2894_s1 }
  0x15   : > { %p2614_p11 = pnand %p2177_p9, %p2585_p1 }
  0x17   : > { %p2378_p13 = pneg %p2614_p11 }
  0x19   : > { %p2379_p0 = pnand %p2378_p13, %p2377_p12 }
  0x1b   : > { %p2380_p3 = pneg %p2379_p0 }
  0x1d   : > { %p2385_p7 = pnand %p2383_p5, %p2380_p3 }
  0x1f   : > { %2388 = shalt.err (!%p2385_p7)
}
  0x20   : > { %s2389_s9 = scalar_lea.vmem %s146_s26, 4096  ;;  %p2397_p1 = scmp.lt.s32.totalorder %s146_s26, %s146_s26 }
  0x21   : > { %p2390_p9 = scmp.ne.s32.totalorder %s146_s26, %s2389_s9  ;;  %p2398_p4 = scmp.lt.s32.totalorder %s2389_s9, %s2389_s9 }
  0x23   : > { %p2392_p10 = pnand %p2390_p9, %p2378_p13  ;;  %p2399_p8 = por %p2398_p4, %p2397_p1 }
  0x25   : > { %p2393_p6 = pneg %p2392_p10 }
  0x27   : > { %p2400_p2 = pnand %p2399_p8, %p2393_p6 }
  0x29   : > { %2403 = shalt.err (!%p2400_p2)
}
  0x2a   : > { %s2523_s10 = smov 64   ;;  %s2524_s11 = smov 4  }
  0x2b   : > { %2180 = dma.hbm_to_vmem [thread:$0]  (!%p2614_p11), %s2894_s1, 4096, %s146_s26, [#allocation7], %s2523_s10, %s2523_s10, %s2524_s11  }
  0x2c   : > { %p34_p1 = scmp.ge.s32.totalorder %s32_s28, 2  ;;  %s41_s25 = sadd.s32 1, %s2508_s14 }
  0x2d   : > { %p48_p2 = scmp.ne.s32.totalorder %s2508_s14, %s2504_s13  ;;  %p49_p4 = scmp.eq.s32.totalorder %s2520_s17, 0 }
  0x2e   : > { %s2922_s28 = smov (%p34_p1, %s32_s28), 0  ;;  %p2908_p8 = scmp.ne.s32.totalorder %s2902_s21, 0 }
  0x2f   : > { %p2641_p6 = por %p49_p4, %p48_p2  ;;  %s36_s27 = ssub.s32 %s2516_s16, %s2922_s28 }
  0x30   : > { %p2647_p10 = por %p2908_p8, %p48_p2  ;;  %p2190_p12 = scmp.lt.s32.totalorder %s2520_s17, 2 }
  0x31   : > { %p39_p11 = scmp.eq.s32.totalorder %s36_s27, 0  ;;  %s162_s26 = sand.u32 1, %s2508_s14  }
  0x32   : > { %s1673_s4 = sshll.u32 %s162_s26, 9  ;;  %s1816_s6 = sshll.u32 %s2516_s16, 13 }
  0x33   : > { %s2656_s5 = scalar_select %p39_p11, %s2508_s14, %s41_s25  }
  0x34   : > { %s2662_s9 = scalar_lea.hbm %s2893_s0, %s1816_s6  ;;  %s166_s21 = scalar_lea.vmem [#allocation3], %s1673_s4 }
  0x35   : > { %s176_s10 = sshll.u32 %s166_s21, 4  ;;  %p2668_p13 = pnand %p2190_p12, %p2641_p6  ;;  %s2664_s10 = int_to_ptr.vmem [resolvable:$true] %s176_s10 }
  0x36   : > { %s2672_s18 = scalar_lea.sflag [#allocation4], %s162_s26  ;;  %s2404_s19 = scalar_lea.hbm %s2662_s9, 8192 }
  0x37   : > { %p2405_p0 = scmp.ne.s32.totalorder %s2662_s9, %s2404_s19  ;;  %p2406_p3 = pneg %p2668_p13 }
  0x38   : > { %s2409_s29 = scalar_lea.hbm %s2893_s0, 16384  ;;  %p2410_p9 = scmp.lt.u32.totalorder %s2662_s9, %s2893_s0 }
  0x39   : > { %p2407_p5 = pnand %p2406_p3, %p2405_p0  ;;  %p2411_p1 = scmp.lt.u32.totalorder %s2409_s29, %s2404_s19 }
  0x3a   : > { %p2413_p4 = scmp.lt.u32.totalorder %s2404_s19, %s2662_s9 }
  0x3b   : > { %p2408_p7 = pneg %p2407_p5  ;;  %p2412_p2 = por %p2411_p1, %p2410_p9 }
  0x3d   : > { %p2414_p6 = por %p2413_p4, %p2412_p2 }
  0x3f   : > { %p2415_p8 = pnand %p2414_p6, %p2408_p7 }
  0x41   : > { %2418 = shalt.err (!%p2415_p8)
}
  0x42   : > { %s2419_s26 = scalar_lea.vmem %s2664_s10, 8192  ;;  %s2525_s7 = smov [#allocation3]  }
  0x43   : > { %p2420_p12 = scmp.ne.s32.totalorder %s2664_s10, %s2419_s26  ;;  %s2424_s8 = sshll.u32 %s2525_s7, 4  ;;  %s2425_s8 = int_to_ptr.vmem [resolvable:$false] %s2424_s8 }
  0x44   : > { %s2426_s21 = scalar_lea.vmem %s2425_s8, 16384  ;;  %p2427_p5 = scmp.lt.s32.totalorder %s2664_s10, %s2425_s8 }
  0x45   : > { %p2422_p11 = pnand %p2420_p12, %p2406_p3  ;;  %p2428_p9 = scmp.lt.s32.totalorder %s2426_s21, %s2419_s26 }
  0x47   : > { %p2423_p0 = pneg %p2422_p11  ;;  %p2429_p1 = por %p2428_p9, %p2427_p5 }
  0x49   : > { %p2430_p2 = pnand %p2429_p1, %p2423_p0 }
  0x4b   : > { %2433 = shalt.err (!%p2430_p2)
}
  0x4c   : > { %s2526_s19 = smov 256   ;;  %s2527_s25 = smov 16  }
  0x4d   : > { %2184 = dma.hbm_to_vmem [thread:$0]  (!%p2668_p13), %s2662_s9, 8192, %s2664_s10, %s2672_s18, %s2526_s19, %s2526_s19, %s2527_s25  }
  0x4e   : > { %p2911_p3 = scmp.ne.s32.totalorder %s2905_s24, 0 }
  0x4f   : > { %s2703_s27 = sand.u32 (!%p2911_p3), 1, %s2504_s13   ;;  %p2912_p7 = scmp.ne.s32.totalorder (!%p2911_p3), %s2903_s22, 0 }
  0x50   : > { %188 = sbr.rel (%p2911_p3) target bundleno = 484 (0x1e4), region = 32  ;;  %s1678_s29 = sshll.u32 (!%p2911_p3), %s2703_s27, 9 }
  0x51   : > { %s191_s4 = scalar_lea.sflag (!%p2911_p3), [#allocation4], %s2703_s27  ;;  %s2707_s6 = scalar_lea.vmem (!%p2911_p3), [#allocation3], %s1678_s29 }
  0x57   : > { %2487 = dma.done.wait (%p2912_p7), %s191_s4, 8192  }
  0x58   : > { %2489 = vsyncadd (%p2912_p7), %s191_s4, 4294959104  ;;  %p2913_p13 = scmp.ne.s32.totalorder %s2901_s20, 0 }
  0x5a   : > { %2491 = dma.done.wait (%p2913_p13), [#allocation7], 4096  }
  0x5b   : > { %2493 = vsyncadd (%p2913_p13), [#allocation7], 4294963200  ;;  %v2248_v0 = vld [vmem:[#allocation6 + $0x40] sm:$0xff]   ;;  %v2252_v4 = vld [vmem:[#allocation6 + $0x48] sm:$0xff]   ;;  %s1680_s24 = sshll.u32 %s2703_s27, 7  ;;  %s1849_s10 = sshll.u32 %s2512_s15, 11 }
  0x5c   : > { %v2249_v1 = vld [vmem:[#allocation6 + $0xc0] sm:$0xff]   ;;  %1945 = vmatprep.subr.bf16.mxu0 %v2248_v0  ;;  %v2253_v5 = vld [vmem:[#allocation6 + $0xc8] sm:$0xff]   ;;  %v2256_v8 = vld [vmem:[#allocation6 + $0x50] sm:$0xff]   ;;  %s2789_s9 = scalar_lea.vmem [#allocation8], %s1680_s24  ;;  %s2841_s7 = scalar_lea.hbm %s2896_s3, %s1849_s10 }
  0x5d   : > { %v2250_v2 = vld [vmem:[#allocation6] sm:$0xff]   ;;  %2057 = vmatprep.subr.bf16.mxu1 %v2249_v1  ;;  %v2254_v6 = vld [vmem:[#allocation6 + $0x8] sm:$0xff]   ;;  %v2257_v9 = vld [vmem:[#allocation6 + $0xd0] sm:$0xff]   ;;  %s1572_s11 = sshll.u32 %s2789_s9, 4  ;;  %s1559_s8 = scalar_lea.sflag [#allocation5], %s2703_s27  ;;  %s2843_s11 = int_to_ptr.vmem [resolvable:$true] %s1572_s11 }
  0x5e   : > { %v2251_v3 = vld [vmem:[#allocation6 + $0x80] sm:$0xff]   ;;  %1946 = vmatpush3.bf16.msra.mxu0 %v2250_v2  ;;  %v2255_v7 = vld [vmem:[#allocation6 + $0x88] sm:$0xff]   ;;  %v2258_v10 = vld [vmem:[#allocation6 + $0x10] sm:$0xff]   ;;  %s2434_s21 = scalar_lea.vmem %s2843_s11, 2048  ;;  %s2528_s15 = smov [#allocation8]  }
  0x5f   : > { %2058 = vmatpush3.bf16.msra.mxu1 %v2251_v3  ;;  %1947 = vmatprep.subr.bf16.mxu0 %v2252_v4  ;;  %v2259_v11 = vld [vmem:[#allocation6 + $0x90] sm:$0xff]   ;;  %v2260_v12 = vld [vmem:[#allocation6 + $0x58] sm:$0xff]   ;;  %v2264_v16 = vld [vmem:[#allocation6 + $0x60] sm:$0xff]   ;;  %p2435_p4 = scmp.ne.s32.totalorder %s2843_s11, %s2434_s21  ;;  %s2438_s19 = sshll.u32 %s2528_s15, 4  ;;  %s2439_s19 = int_to_ptr.vmem [resolvable:$false] %s2438_s19 }
  0x60   : > { %2059 = vmatprep.subr.bf16.mxu1 %v2253_v5  ;;  %v2261_v13 = vld [vmem:[#allocation6 + $0xd8] sm:$0xff]   ;;  %v2265_v17 = vld [vmem:[#allocation6 + $0xe0] sm:$0xff]   ;;  %v2268_v20 = vld [vmem:[#allocation6 + $0x68] sm:$0xff]   ;;  %s2440_s25 = scalar_lea.vmem %s2439_s19, 4096  ;;  %p2441_p12 = scmp.lt.s32.totalorder %s2843_s11, %s2439_s19 }
  0x61   : > { %v2262_v14 = vld [vmem:[#allocation6 + $0x18] sm:$0xff]   ;;  %v2266_v18 = vld [vmem:[#allocation6 + $0x20] sm:$0xff]   ;;  %v2269_v21 = vld [vmem:[#allocation6 + $0xe8] sm:$0xff]   ;;  %p2436_p6 = pnand %p2435_p4, %p2647_p10  ;;  %p2442_p11 = scmp.lt.s32.totalorder %s2440_s25, %s2434_s21 }
  0x62   : > { %1948 = vmatpush3.bf16.msra.mxu0 %v2254_v6  ;;  %v2263_v15 = vld [vmem:[#allocation6 + $0x98] sm:$0xff]   ;;  %v2267_v19 = vld [vmem:[#allocation6 + $0xa0] sm:$0xff]   ;;  %v2270_v22 = vld [vmem:[#allocation6 + $0x28] sm:$0xff]  }
  0x63   : > { %2060 = vmatpush3.bf16.msra.mxu1 %v2255_v7  ;;  %1949 = vmatprep.subr.bf16.mxu0 %v2256_v8  ;;  %v2271_v23 = vld [vmem:[#allocation6 + $0xa8] sm:$0xff]   ;;  %v2272_v24 = vld [vmem:[#allocation6 + $0x70] sm:$0xff]   ;;  %v2276_v28 = vld [vmem:[#allocation6 + $0x78] sm:$0xff]   ;;  %p2437_p8 = pneg %p2436_p6  ;;  %p2443_p0 = por %p2442_p11, %p2441_p12 }
  0x64   : > { %2061 = vmatprep.subr.bf16.mxu1 %v2257_v9  ;;  %v2273_v25 = vld [vmem:[#allocation6 + $0xf0] sm:$0xff]   ;;  %v2277_v29 = vld [vmem:[#allocation6 + $0xf8] sm:$0xff]  }
  0x65   : > { %v2274_v26 = vld [vmem:[#allocation6 + $0x30] sm:$0xff]   ;;  %v2278_v30 = vld [vmem:[#allocation6 + $0x38] sm:$0xff]   ;;  %p2444_p5 = pnand %p2443_p0, %p2437_p8 }
  0x66   : > { %1950 = vmatpush3.bf16.msra.mxu0 %v2258_v10  ;;  %v2275_v27 = vld [vmem:[#allocation6 + $0xb0] sm:$0xff]   ;;  %v2279_v31 = vld [vmem:[#allocation6 + $0xb8] sm:$0xff]  }
  0x67   : > { %2062 = vmatpush3.bf16.msra.mxu1 %v2259_v11  ;;  %1951 = vmatprep.subr.bf16.mxu0 %v2260_v12  ;;  %v2280_v32 = vld [vmem:[%s2707_s6] ss:$16 sps:$4 sm:$0xff]   ;;  %v2282_v33 = vld [vmem:[%s2707_s6 + $0x4] ss:$16 sps:$4 sm:$0xff]   ;;  %v2283_v34 = vld [vmem:[%s2707_s6 + $0x8] ss:$16 sps:$4 sm:$0xff]  }
  0x68   : > { %2063 = vmatprep.subr.bf16.mxu1 %v2261_v13  ;;  %v2285_v35 = vld [vmem:[%s2707_s6 + $0xc] ss:$16 sps:$4 sm:$0xff]   ;;  %970 = vmatprep.mubr.bf16.mxu0 %v2282_v33  ;;  %v2286_v36 = vld [vmem:[%s2707_s6 + $0x24] ss:$16 sps:$4 sm:$0xff]   ;;  %v2290_v38 = vld [vmem:[%s2707_s6 + $0x20] ss:$16 sps:$4 sm:$0xff]  }
  0x69   : > { %1131 = vmatprep.mubr.bf16.mxu1 %v2285_v35  ;;  %v2288_v37 = vld [vmem:[%s2707_s6 + $0x2c] ss:$16 sps:$4 sm:$0xff]   ;;  %v2291_v39 = vld [vmem:[%s2707_s6 + $0x28] ss:$16 sps:$4 sm:$0xff]   ;;  %v2292_v40 = vld [vmem:[%s2707_s6 + $0x44] ss:$16 sps:$4 sm:$0xff]  }
  0x6a   : > { %1952 = vmatpush3.bf16.msra.mxu0 %v2262_v14  ;;  %v2294_v41 = vld [vmem:[%s2707_s6 + $0x4c] ss:$16 sps:$4 sm:$0xff]   ;;  %v2296_v42 = vld [vmem:[%s2707_s6 + $0x40] ss:$16 sps:$4 sm:$0xff]   ;;  %v2297_v43 = vld [vmem:[%s2707_s6 + $0x48] ss:$16 sps:$4 sm:$0xff]  }
  0x6b   : > { %2064 = vmatpush3.bf16.msra.mxu1 %v2263_v15  ;;  %1953 = vmatprep.subr.bf16.mxu0 %v2264_v16  ;;  %v2298_v44 = vld [vmem:[%s2707_s6 + $0x64] ss:$16 sps:$4 sm:$0xff]   ;;  %v2300_v45 = vld [vmem:[%s2707_s6 + $0x6c] ss:$16 sps:$4 sm:$0xff]   ;;  %v2302_v46 = vld [vmem:[%s2707_s6 + $0x60] ss:$16 sps:$4 sm:$0xff]  }
  0x6c   : > { %2065 = vmatprep.subr.bf16.mxu1 %v2265_v17  ;;  %v2303_v47 = vld [vmem:[%s2707_s6 + $0x68] ss:$16 sps:$4 sm:$0xff]   ;;  %v2304_v48 = vld [vmem:[%s2707_s6 + $0x84] ss:$16 sps:$4 sm:$0xff]   ;;  %v2306_v49 = vld [vmem:[%s2707_s6 + $0x8c] ss:$16 sps:$4 sm:$0xff]  }
  0x6d   : > { %v2308_v50 = vld [vmem:[%s2707_s6 + $0x80] ss:$16 sps:$4 sm:$0xff]   ;;  %v2309_v51 = vld [vmem:[%s2707_s6 + $0x88] ss:$16 sps:$4 sm:$0xff]   ;;  %v2310_v52 = vld [vmem:[%s2707_s6 + $0xa4] ss:$16 sps:$4 sm:$0xff]  }
  0x6e   : > { %1954 = vmatpush3.bf16.msra.mxu0 %v2266_v18  ;;  %v2312_v53 = vld [vmem:[%s2707_s6 + $0xac] ss:$16 sps:$4 sm:$0xff]   ;;  %v2314_v54 = vld [vmem:[%s2707_s6 + $0xa0] ss:$16 sps:$4 sm:$0xff]   ;;  %v2315_v55 = vld [vmem:[%s2707_s6 + $0xa8] ss:$16 sps:$4 sm:$0xff]  }
  0x6f   : > { %2066 = vmatpush3.bf16.msra.mxu1 %v2267_v19  ;;  %1955 = vmatprep.subr.bf16.mxu0 %v2268_v20  ;;  %v2316_v56 = vld [vmem:[%s2707_s6 + $0xc4] ss:$16 sps:$4 sm:$0xff]   ;;  %v2318_v57 = vld [vmem:[%s2707_s6 + $0xcc] ss:$16 sps:$4 sm:$0xff]   ;;  %v2320_v58 = vld [vmem:[%s2707_s6 + $0xc0] ss:$16 sps:$4 sm:$0xff]  }
  0x70   : > { %2067 = vmatprep.subr.bf16.mxu1 %v2269_v21  ;;  %v2321_v59 = vld [vmem:[%s2707_s6 + $0xc8] ss:$16 sps:$4 sm:$0xff]   ;;  %v2322_v60 = vld [vmem:[%s2707_s6 + $0xe4] ss:$16 sps:$4 sm:$0xff]   ;;  %v2324_v61 = vld [vmem:[%s2707_s6 + $0xec] ss:$16 sps:$4 sm:$0xff]  }
  0x71   : > { %v2326_v62 = vld [vmem:[%s2707_s6 + $0xe0] ss:$16 sps:$4 sm:$0xff]   ;;  %v2327_v63 = vld [vmem:[%s2707_s6 + $0xe8] ss:$16 sps:$4 sm:$0xff]   ;;  %v2328_v0 = vld [vmem:[%s2707_s6 + $0x104] ss:$16 sps:$4 sm:$0xff]  }
  0x72   : > { %1956 = vmatpush3.bf16.msra.mxu0 %v2270_v22  ;;  %v2330_v1 = vld [vmem:[%s2707_s6 + $0x10c] ss:$16 sps:$4 sm:$0xff]   ;;  %v2332_v2 = vld [vmem:[%s2707_s6 + $0x100] ss:$16 sps:$4 sm:$0xff]   ;;  %v2333_v3 = vld [vmem:[%s2707_s6 + $0x108] ss:$16 sps:$4 sm:$0xff]  }
  0x73   : > { %2068 = vmatpush3.bf16.msra.mxu1 %v2271_v23  ;;  %1957 = vmatprep.subr.bf16.mxu0 %v2272_v24  ;;  %v2334_v4 = vld [vmem:[%s2707_s6 + $0x124] ss:$16 sps:$4 sm:$0xff]   ;;  %v2336_v5 = vld [vmem:[%s2707_s6 + $0x12c] ss:$16 sps:$4 sm:$0xff]   ;;  %v2338_v6 = vld [vmem:[%s2707_s6 + $0x120] ss:$16 sps:$4 sm:$0xff]  }
  0x74   : > { %2069 = vmatprep.subr.bf16.mxu1 %v2273_v25  ;;  %v2339_v7 = vld [vmem:[%s2707_s6 + $0x128] ss:$16 sps:$4 sm:$0xff]   ;;  %v2340_v8 = vld [vmem:[%s2707_s6 + $0x144] ss:$16 sps:$4 sm:$0xff]   ;;  %v2342_v9 = vld [vmem:[%s2707_s6 + $0x14c] ss:$16 sps:$4 sm:$0xff]  }
  0x75   : > { %v2344_v10 = vld [vmem:[%s2707_s6 + $0x140] ss:$16 sps:$4 sm:$0xff]   ;;  %v2345_v11 = vld [vmem:[%s2707_s6 + $0x148] ss:$16 sps:$4 sm:$0xff]   ;;  %v2346_v12 = vld [vmem:[%s2707_s6 + $0x164] ss:$16 sps:$4 sm:$0xff]  }
  0x76   : > { %1958 = vmatpush3.bf16.msra.mxu0 %v2274_v26  ;;  %v2348_v13 = vld [vmem:[%s2707_s6 + $0x16c] ss:$16 sps:$4 sm:$0xff]   ;;  %v2350_v14 = vld [vmem:[%s2707_s6 + $0x160] ss:$16 sps:$4 sm:$0xff]   ;;  %v2351_v15 = vld [vmem:[%s2707_s6 + $0x168] ss:$16 sps:$4 sm:$0xff]  }
  0x77   : > { %2070 = vmatpush3.bf16.msra.mxu1 %v2275_v27  ;;  %1959 = vmatprep.subr.bf16.mxu0 %v2276_v28  ;;  %v2352_v16 = vld [vmem:[%s2707_s6 + $0x184] ss:$16 sps:$4 sm:$0xff]   ;;  %v2354_v17 = vld [vmem:[%s2707_s6 + $0x18c] ss:$16 sps:$4 sm:$0xff]   ;;  %v2356_v18 = vld [vmem:[%s2707_s6 + $0x180] ss:$16 sps:$4 sm:$0xff]  }
  0x78   : > { %2071 = vmatprep.subr.bf16.mxu1 %v2277_v29  ;;  %v2357_v19 = vld [vmem:[%s2707_s6 + $0x188] ss:$16 sps:$4 sm:$0xff]   ;;  %v2358_v20 = vld [vmem:[%s2707_s6 + $0x1a4] ss:$16 sps:$4 sm:$0xff]   ;;  %v2360_v21 = vld [vmem:[%s2707_s6 + $0x1ac] ss:$16 sps:$4 sm:$0xff]  }
  0x79   : > { %v2362_v22 = vld [vmem:[%s2707_s6 + $0x1a0] ss:$16 sps:$4 sm:$0xff]   ;;  %v2363_v23 = vld [vmem:[%s2707_s6 + $0x1a8] ss:$16 sps:$4 sm:$0xff]   ;;  %v2364_v24 = vld [vmem:[%s2707_s6 + $0x1c4] ss:$16 sps:$4 sm:$0xff]  }
  0x7a   : > { %1960 = vmatpush3.bf16.msra.mxu0 %v2278_v30  ;;  %v2366_v25 = vld [vmem:[%s2707_s6 + $0x1cc] ss:$16 sps:$4 sm:$0xff]   ;;  %v2368_v26 = vld [vmem:[%s2707_s6 + $0x1c0] ss:$16 sps:$4 sm:$0xff]   ;;  %v2369_v27 = vld [vmem:[%s2707_s6 + $0x1c8] ss:$16 sps:$4 sm:$0xff]  }
  0x7b   : > { %2072 = vmatpush3.bf16.msra.mxu1 %v2279_v31  ;;  %v2370_v28 = vld [vmem:[%s2707_s6 + $0x1e4] ss:$16 sps:$4 sm:$0xff]   ;;  %v2372_v29 = vld [vmem:[%s2707_s6 + $0x1ec] ss:$16 sps:$4 sm:$0xff]   ;;  %v2374_v30 = vld [vmem:[%s2707_s6 + $0x1e0] ss:$16 sps:$4 sm:$0xff]  }
  0x7c   : > { %v2375_v31 = vld [vmem:[%s2707_s6 + $0x1e8] ss:$16 sps:$4 sm:$0xff]  }
  0x7d   : > { %971 = vmatmul.mubr.bf16.vlgmr.msra.gmra.mrb[0].mxu0 %v2280_v32 }
  0x7e   : > { %1132 = vmatmul.mubr.bf16.vlgmr.msra.gmra.mrb[0].mxu1 %v2283_v34  ;;  %978 = vmatprep.mubr.bf16.mxu0 %v2286_v36 }
  0x7f   : > { %1139 = vmatprep.mubr.bf16.mxu1 %v2288_v37 }
  0x85   : > { %979 = vmatmul.mubr.bf16.gmra.mrb[4].mxu0 %v2290_v38 }
  0x86   : > { %1140 = vmatmul.mubr.bf16.gmra.mrb[4].mxu1 %v2291_v39  ;;  %986 = vmatprep.mubr.bf16.mxu0 %v2292_v40 }
  0x87   : > { %1147 = vmatprep.mubr.bf16.mxu1 %v2294_v41 }
  0x8d   : > { %987 = vmatmul.mubr.bf16.gmra.mrb[8].mxu0 %v2296_v42 }
  0x8e   : > { %1148 = vmatmul.mubr.bf16.gmra.mrb[8].mxu1 %v2297_v43  ;;  %994 = vmatprep.mubr.bf16.mxu0 %v2298_v44 }
  0x8f   : > { %1155 = vmatprep.mubr.bf16.mxu1 %v2300_v45  ;;  %v2784_v45 = vld [vmem:[%s2895_s2] ss:$0 sm:$0xff] }
  0x95   : > { %995 = vmatmul.mubr.bf16.gmra.mrb[12].mxu0 %v2302_v46 }
  0x96   : > { %1156 = vmatmul.mubr.bf16.gmra.mrb[12].mxu1 %v2303_v47  ;;  %1002 = vmatprep.mubr.bf16.mxu0 %v2304_v48 }
  0x97   : > { %1163 = vmatprep.mubr.bf16.mxu1 %v2306_v49 }
  0x9d   : > { %1003 = vmatmul.mubr.bf16.gmra.mrb[16].mxu0 %v2308_v50 }
  0x9e   : > { %1164 = vmatmul.mubr.bf16.gmra.mrb[16].mxu1 %v2309_v51  ;;  %1010 = vmatprep.mubr.bf16.mxu0 %v2310_v52 }
  0x9f   : > { %1171 = vmatprep.mubr.bf16.mxu1 %v2312_v53 }
  0xa5   : > { %1011 = vmatmul.mubr.bf16.gmra.mrb[20].mxu0 %v2314_v54 }
  0xa6   : > { %1172 = vmatmul.mubr.bf16.gmra.mrb[20].mxu1 %v2315_v55  ;;  %1018 = vmatprep.mubr.bf16.mxu0 %v2316_v56 }
  0xa7   : > { %1179 = vmatprep.mubr.bf16.mxu1 %v2318_v57 }
  0xad   : > { %1019 = vmatmul.mubr.bf16.gmra.mrb[24].mxu0 %v2320_v58 }
  0xae   : > { %1180 = vmatmul.mubr.bf16.gmra.mrb[24].mxu1 %v2321_v59  ;;  %1026 = vmatprep.mubr.bf16.mxu0 %v2322_v60 }
  0xaf   : > { %1187 = vmatprep.mubr.bf16.mxu1 %v2324_v61 }
  0xb5   : > { %1027 = vmatmul.mubr.bf16.gmra.mrb[28].mxu0 %v2326_v62 }
  0xb6   : > { %1188 = vmatmul.mubr.bf16.gmra.mrb[28].mxu1 %v2327_v63  ;;  %1034 = vmatprep.mubr.bf16.mxu0 %v2328_v0 }
  0xb7   : > { %1195 = vmatprep.mubr.bf16.mxu1 %v2330_v1 }
  0xbd   : > { %1035 = vmatmul.mubr.bf16.gmra.mrb[32].mxu0 %v2332_v2 }
  0xbe   : > { %1196 = vmatmul.mubr.bf16.gmra.mrb[32].mxu1 %v2333_v3  ;;  %1042 = vmatprep.mubr.bf16.mxu0 %v2334_v4 }
  0xbf   : > { %1203 = vmatprep.mubr.bf16.mxu1 %v2336_v5 }
  0xc5   : > { %1043 = vmatmul.mubr.bf16.gmra.mrb[36].mxu0 %v2338_v6 }
  0xc6   : > { %1204 = vmatmul.mubr.bf16.gmra.mrb[36].mxu1 %v2339_v7  ;;  %1050 = vmatprep.mubr.bf16.mxu0 %v2340_v8 }
  0xc7   : > { %1211 = vmatprep.mubr.bf16.mxu1 %v2342_v9 }
  0xcd   : > { %1051 = vmatmul.mubr.bf16.gmra.mrb[40].mxu0 %v2344_v10 }
  0xce   : > { %1212 = vmatmul.mubr.bf16.gmra.mrb[40].mxu1 %v2345_v11  ;;  %1058 = vmatprep.mubr.bf16.mxu0 %v2346_v12 }
  0xcf   : > { %1219 = vmatprep.mubr.bf16.mxu1 %v2348_v13 }
  0xd5   : > { %1059 = vmatmul.mubr.bf16.gmra.mrb[44].mxu0 %v2350_v14 }
  0xd6   : > { %1220 = vmatmul.mubr.bf16.gmra.mrb[44].mxu1 %v2351_v15  ;;  %1066 = vmatprep.mubr.bf16.mxu0 %v2352_v16 }
  0xd7   : > { %1227 = vmatprep.mubr.bf16.mxu1 %v2354_v17 }
  0xdd   : > { %1067 = vmatmul.mubr.bf16.gmra.mrb[48].mxu0 %v2356_v18 }
  0xde   : > { %1228 = vmatmul.mubr.bf16.gmra.mrb[48].mxu1 %v2357_v19  ;;  %1074 = vmatprep.mubr.bf16.mxu0 %v2358_v20 }
  0xdf   : > { %1235 = vmatprep.mubr.bf16.mxu1 %v2360_v21 }
  0xe5   : > { %1075 = vmatmul.mubr.bf16.gmra.mrb[52].mxu0 %v2362_v22 }
  0xe6   : > { %1236 = vmatmul.mubr.bf16.gmra.mrb[52].mxu1 %v2363_v23  ;;  %1082 = vmatprep.mubr.bf16.mxu0 %v2364_v24 }
  0xe7   : > { %1243 = vmatprep.mubr.bf16.mxu1 %v2366_v25 }
  0xed   : > { %1083 = vmatmul.mubr.bf16.gmra.mrb[56].mxu0 %v2368_v26 }
  0xee   : > { %1244 = vmatmul.mubr.bf16.gmra.mrb[56].mxu1 %v2369_v27  ;;  %1090 = vmatprep.mubr.bf16.mxu0 %v2370_v28 }
  0xef   : > { %1251 = vmatprep.mubr.bf16.mxu1 %v2372_v29 }
  0xf5   : > { %1091 = vmatmul.mubr.bf16.gmra.mrb[60].mxu0 %v2374_v30 }
  0xf6   : > { %1252 = vmatmul.mubr.bf16.gmra.mrb[60].mxu1 %v2375_v31 }
 0x150   : > { %v1961_v32 = vpop.f32.mrb[0].mxu0 }
 0x151   : > { %v2073_v33 = vpop.f32.mrb[0].mxu1  ;;  %v1962_v34 = vpop.f32.mrb[1].mxu0 }
 0x152   : > { %v1963_v35 = vadd.f32 %v1962_v34, %v1961_v32  ;;  %v2074_v36 = vpop.f32.mrb[1].mxu1  ;;  %v1964_v37 = vpop.f32.mrb[2].mxu0 }
 0x153   : > { %v2075_v38 = vadd.f32 %v2074_v36, %v2073_v33  ;;  %v2076_v39 = vpop.f32.mrb[2].mxu1  ;;  %v1965_v40 = vpop.f32.mrb[3].mxu0 }
 0x154   : > { %v1966_v41 = vadd.f32 %v1965_v40, %v1964_v37  ;;  %v2077_v42 = vpop.f32.mrb[3].mxu1 }
 0x155   : > { %v1134_v43 = vadd.f32 %v2075_v38, %v1963_v35  ;;  %v2078_v44 = vadd.f32 %v2077_v42, %v2076_v39 }
 0x157   : > { %v1137_v46 = vadd.f32 %v2078_v44, %v1966_v41  ;;  %v1366_v48 = vadd.f32 %v2784_v45, %v1134_v43 }
 0x158   : > { %v1967_v47 = vpop.f32.mrb[4].mxu0 }
 0x159   : > { %v1367_v49 = vadd.f32 %v2784_v45, %v1137_v46  ;;  %v2079_v50 = vpop.f32.mrb[4].mxu1  ;;  %v1968_v51 = vpop.f32.mrb[5].mxu0 }
 0x15a   : > { %v1969_v52 = vadd.f32 %v1968_v51, %v1967_v47  ;;  %v2080_v53 = vpop.f32.mrb[5].mxu1  ;;  %v1970_v54 = vpop.f32.mrb[6].mxu0 }
 0x15b   : > { %v1853_v55 = vpack.c.bf16 %v1367_v49, %v1366_v48  ;;  %v2081_v56 = vadd.f32 %v2080_v53, %v2079_v50  ;;  %v2082_v57 = vpop.f32.mrb[6].mxu1  ;;  %v1971_v58 = vpop.f32.mrb[7].mxu0 }
 0x15c   : > { %v1972_v59 = vadd.f32 %v1971_v58, %v1970_v54  ;;  %v2083_v60 = vpop.f32.mrb[7].mxu1 }
 0x15d   : > { %1854 = vst [vmem:[%s2789_s9] sm:$0xff] %v1853_v55   ;;  %v1142_v61 = vadd.f32 %v2081_v56, %v1969_v52  ;;  %v2084_v62 = vadd.f32 %v2083_v60, %v2082_v57 }
 0x15f   : > { %v1145_v63 = vadd.f32 %v2084_v62, %v1972_v59  ;;  %v1368_v1 = vadd.f32 %v2784_v45, %v1142_v61 }
 0x160   : > { %v1973_v0 = vpop.f32.mrb[8].mxu0 }
 0x161   : > { %v1369_v2 = vadd.f32 %v2784_v45, %v1145_v63  ;;  %v2085_v3 = vpop.f32.mrb[8].mxu1  ;;  %v1974_v4 = vpop.f32.mrb[9].mxu0 }
 0x162   : > { %v1975_v5 = vadd.f32 %v1974_v4, %v1973_v0  ;;  %v2086_v6 = vpop.f32.mrb[9].mxu1  ;;  %v1976_v7 = vpop.f32.mrb[10].mxu0 }
 0x163   : > { %v1858_v8 = vpack.c.bf16 %v1369_v2, %v1368_v1  ;;  %v2087_v9 = vadd.f32 %v2086_v6, %v2085_v3  ;;  %v2088_v10 = vpop.f32.mrb[10].mxu1  ;;  %v1977_v11 = vpop.f32.mrb[11].mxu0 }
 0x164   : > { %v1978_v12 = vadd.f32 %v1977_v11, %v1976_v7  ;;  %v2089_v13 = vpop.f32.mrb[11].mxu1 }
 0x165   : > { %1930 = vst [vmem:[%s2789_s9 + $0x8] sm:$0xff] %v1858_v8   ;;  %v1150_v14 = vadd.f32 %v2087_v9, %v1975_v5  ;;  %v2090_v15 = vadd.f32 %v2089_v13, %v2088_v10 }
 0x167   : > { %v1153_v16 = vadd.f32 %v2090_v15, %v1978_v12  ;;  %v1370_v18 = vadd.f32 %v2784_v45, %v1150_v14 }
 0x168   : > { %v1979_v17 = vpop.f32.mrb[12].mxu0 }
 0x169   : > { %v1371_v19 = vadd.f32 %v2784_v45, %v1153_v16  ;;  %v2091_v20 = vpop.f32.mrb[12].mxu1  ;;  %v1980_v21 = vpop.f32.mrb[13].mxu0 }
 0x16a   : > { %v1981_v22 = vadd.f32 %v1980_v21, %v1979_v17  ;;  %v2092_v23 = vpop.f32.mrb[13].mxu1  ;;  %v1982_v24 = vpop.f32.mrb[14].mxu0 }
 0x16b   : > { %v1863_v25 = vpack.c.bf16 %v1371_v19, %v1370_v18  ;;  %v2093_v26 = vadd.f32 %v2092_v23, %v2091_v20  ;;  %v2094_v27 = vpop.f32.mrb[14].mxu1  ;;  %v1983_v28 = vpop.f32.mrb[15].mxu0 }
 0x16c   : > { %v1984_v29 = vadd.f32 %v1983_v28, %v1982_v24  ;;  %v2095_v30 = vpop.f32.mrb[15].mxu1 }
 0x16d   : > { %1931 = vst [vmem:[%s2789_s9 + $0x10] sm:$0xff] %v1863_v25   ;;  %v1158_v31 = vadd.f32 %v2093_v26, %v1981_v22  ;;  %v2096_v32 = vadd.f32 %v2095_v30, %v2094_v27 }
 0x16f   : > { %v1161_v33 = vadd.f32 %v2096_v32, %v1984_v29  ;;  %v1372_v35 = vadd.f32 %v2784_v45, %v1158_v31 }
 0x170   : > { %v1985_v34 = vpop.f32.mrb[16].mxu0 }
 0x171   : > { %v1373_v36 = vadd.f32 %v2784_v45, %v1161_v33  ;;  %v2097_v37 = vpop.f32.mrb[16].mxu1  ;;  %v1986_v38 = vpop.f32.mrb[17].mxu0 }
 0x172   : > { %v1987_v39 = vadd.f32 %v1986_v38, %v1985_v34  ;;  %v2098_v40 = vpop.f32.mrb[17].mxu1  ;;  %v1988_v41 = vpop.f32.mrb[18].mxu0 }
 0x173   : > { %v1868_v42 = vpack.c.bf16 %v1373_v36, %v1372_v35  ;;  %v2099_v43 = vadd.f32 %v2098_v40, %v2097_v37  ;;  %v2100_v44 = vpop.f32.mrb[18].mxu1  ;;  %v1989_v46 = vpop.f32.mrb[19].mxu0 }
 0x174   : > { %v1990_v47 = vadd.f32 %v1989_v46, %v1988_v41  ;;  %v2101_v48 = vpop.f32.mrb[19].mxu1 }
 0x175   : > { %1932 = vst [vmem:[%s2789_s9 + $0x18] sm:$0xff] %v1868_v42   ;;  %v1166_v49 = vadd.f32 %v2099_v43, %v1987_v39  ;;  %v2102_v50 = vadd.f32 %v2101_v48, %v2100_v44 }
 0x177   : > { %v1169_v51 = vadd.f32 %v2102_v50, %v1990_v47  ;;  %v1374_v53 = vadd.f32 %v2784_v45, %v1166_v49 }
 0x178   : > { %v1991_v52 = vpop.f32.mrb[20].mxu0 }
 0x179   : > { %v1375_v54 = vadd.f32 %v2784_v45, %v1169_v51  ;;  %v2103_v55 = vpop.f32.mrb[20].mxu1  ;;  %v1992_v56 = vpop.f32.mrb[21].mxu0 }
 0x17a   : > { %v1993_v57 = vadd.f32 %v1992_v56, %v1991_v52  ;;  %v2104_v58 = vpop.f32.mrb[21].mxu1  ;;  %v1994_v59 = vpop.f32.mrb[22].mxu0 }
 0x17b   : > { %v1873_v60 = vpack.c.bf16 %v1375_v54, %v1374_v53  ;;  %v2105_v61 = vadd.f32 %v2104_v58, %v2103_v55  ;;  %v2106_v62 = vpop.f32.mrb[22].mxu1  ;;  %v1995_v63 = vpop.f32.mrb[23].mxu0 }
 0x17c   : > { %v1996_v0 = vadd.f32 %v1995_v63, %v1994_v59  ;;  %v2107_v1 = vpop.f32.mrb[23].mxu1 }
 0x17d   : > { %1933 = vst [vmem:[%s2789_s9 + $0x20] sm:$0xff] %v1873_v60   ;;  %v1174_v2 = vadd.f32 %v2105_v61, %v1993_v57  ;;  %v2108_v3 = vadd.f32 %v2107_v1, %v2106_v62 }
 0x17f   : > { %v1177_v4 = vadd.f32 %v2108_v3, %v1996_v0  ;;  %v1376_v6 = vadd.f32 %v2784_v45, %v1174_v2 }
 0x180   : > { %v1997_v5 = vpop.f32.mrb[24].mxu0 }
 0x181   : > { %v1377_v7 = vadd.f32 %v2784_v45, %v1177_v4  ;;  %v2109_v8 = vpop.f32.mrb[24].mxu1  ;;  %v1998_v9 = vpop.f32.mrb[25].mxu0 }
 0x182   : > { %v1999_v10 = vadd.f32 %v1998_v9, %v1997_v5  ;;  %v2110_v11 = vpop.f32.mrb[25].mxu1  ;;  %v2000_v12 = vpop.f32.mrb[26].mxu0 }
 0x183   : > { %v1878_v13 = vpack.c.bf16 %v1377_v7, %v1376_v6  ;;  %v2111_v14 = vadd.f32 %v2110_v11, %v2109_v8  ;;  %v2112_v15 = vpop.f32.mrb[26].mxu1  ;;  %v2001_v16 = vpop.f32.mrb[27].mxu0 }
 0x184   : > { %v2002_v17 = vadd.f32 %v2001_v16, %v2000_v12  ;;  %v2113_v18 = vpop.f32.mrb[27].mxu1 }
 0x185   : > { %1934 = vst [vmem:[%s2789_s9 + $0x28] sm:$0xff] %v1878_v13   ;;  %v1182_v19 = vadd.f32 %v2111_v14, %v1999_v10  ;;  %v2114_v20 = vadd.f32 %v2113_v18, %v2112_v15 }
 0x187   : > { %v1185_v21 = vadd.f32 %v2114_v20, %v2002_v17  ;;  %v1378_v23 = vadd.f32 %v2784_v45, %v1182_v19 }
 0x188   : > { %v2003_v22 = vpop.f32.mrb[28].mxu0 }
 0x189   : > { %v1379_v24 = vadd.f32 %v2784_v45, %v1185_v21  ;;  %v2115_v25 = vpop.f32.mrb[28].mxu1  ;;  %v2004_v26 = vpop.f32.mrb[29].mxu0 }
 0x18a   : > { %v2005_v27 = vadd.f32 %v2004_v26, %v2003_v22  ;;  %v2116_v28 = vpop.f32.mrb[29].mxu1  ;;  %v2006_v29 = vpop.f32.mrb[30].mxu0 }
 0x18b   : > { %v1883_v30 = vpack.c.bf16 %v1379_v24, %v1378_v23  ;;  %v2117_v31 = vadd.f32 %v2116_v28, %v2115_v25  ;;  %v2118_v32 = vpop.f32.mrb[30].mxu1  ;;  %v2007_v33 = vpop.f32.mrb[31].mxu0 }
 0x18c   : > { %v2008_v34 = vadd.f32 %v2007_v33, %v2006_v29  ;;  %v2119_v35 = vpop.f32.mrb[31].mxu1 }
 0x18d   : > { %1935 = vst [vmem:[%s2789_s9 + $0x30] sm:$0xff] %v1883_v30   ;;  %v1190_v36 = vadd.f32 %v2117_v31, %v2005_v27  ;;  %v2120_v37 = vadd.f32 %v2119_v35, %v2118_v32 }
 0x18f   : > { %v1193_v38 = vadd.f32 %v2120_v37, %v2008_v34  ;;  %v1380_v40 = vadd.f32 %v2784_v45, %v1190_v36 }
 0x190   : > { %v2009_v39 = vpop.f32.mrb[32].mxu0 }
 0x191   : > { %v1381_v41 = vadd.f32 %v2784_v45, %v1193_v38  ;;  %v2121_v42 = vpop.f32.mrb[32].mxu1  ;;  %v2010_v43 = vpop.f32.mrb[33].mxu0 }
 0x192   : > { %v2011_v44 = vadd.f32 %v2010_v43, %v2009_v39  ;;  %v2122_v46 = vpop.f32.mrb[33].mxu1  ;;  %v2012_v47 = vpop.f32.mrb[34].mxu0 }
 0x193   : > { %v1888_v48 = vpack.c.bf16 %v1381_v41, %v1380_v40  ;;  %v2123_v49 = vadd.f32 %v2122_v46, %v2121_v42  ;;  %v2124_v50 = vpop.f32.mrb[34].mxu1  ;;  %v2013_v51 = vpop.f32.mrb[35].mxu0 }
 0x194   : > { %v2014_v52 = vadd.f32 %v2013_v51, %v2012_v47  ;;  %v2125_v53 = vpop.f32.mrb[35].mxu1 }
 0x195   : > { %1936 = vst [vmem:[%s2789_s9 + $0x38] sm:$0xff] %v1888_v48   ;;  %v1198_v54 = vadd.f32 %v2123_v49, %v2011_v44  ;;  %v2126_v55 = vadd.f32 %v2125_v53, %v2124_v50 }
 0x197   : > { %v1201_v56 = vadd.f32 %v2126_v55, %v2014_v52  ;;  %v1382_v58 = vadd.f32 %v2784_v45, %v1198_v54 }
 0x198   : > { %v2015_v57 = vpop.f32.mrb[36].mxu0 }
 0x199   : > { %v1383_v59 = vadd.f32 %v2784_v45, %v1201_v56  ;;  %v2127_v60 = vpop.f32.mrb[36].mxu1  ;;  %v2016_v61 = vpop.f32.mrb[37].mxu0 }
 0x19a   : > { %v2017_v62 = vadd.f32 %v2016_v61, %v2015_v57  ;;  %v2128_v63 = vpop.f32.mrb[37].mxu1  ;;  %v2018_v0 = vpop.f32.mrb[38].mxu0 }
 0x19b   : > { %v1893_v1 = vpack.c.bf16 %v1383_v59, %v1382_v58  ;;  %v2129_v2 = vadd.f32 %v2128_v63, %v2127_v60  ;;  %v2130_v3 = vpop.f32.mrb[38].mxu1  ;;  %v2019_v4 = vpop.f32.mrb[39].mxu0 }
 0x19c   : > { %v2020_v5 = vadd.f32 %v2019_v4, %v2018_v0  ;;  %v2131_v6 = vpop.f32.mrb[39].mxu1 }
 0x19d   : > { %1937 = vst [vmem:[%s2789_s9 + $0x40] sm:$0xff] %v1893_v1   ;;  %v1206_v7 = vadd.f32 %v2129_v2, %v2017_v62  ;;  %v2132_v8 = vadd.f32 %v2131_v6, %v2130_v3 }
 0x19f   : > { %v1209_v9 = vadd.f32 %v2132_v8, %v2020_v5  ;;  %v1384_v11 = vadd.f32 %v2784_v45, %v1206_v7 }
 0x1a0   : > { %v2021_v10 = vpop.f32.mrb[40].mxu0 }
 0x1a1   : > { %v1385_v12 = vadd.f32 %v2784_v45, %v1209_v9  ;;  %v2133_v13 = vpop.f32.mrb[40].mxu1  ;;  %v2022_v14 = vpop.f32.mrb[41].mxu0 }
 0x1a2   : > { %v2023_v15 = vadd.f32 %v2022_v14, %v2021_v10  ;;  %v2134_v16 = vpop.f32.mrb[41].mxu1  ;;  %v2024_v17 = vpop.f32.mrb[42].mxu0 }
 0x1a3   : > { %v1898_v18 = vpack.c.bf16 %v1385_v12, %v1384_v11  ;;  %v2135_v19 = vadd.f32 %v2134_v16, %v2133_v13  ;;  %v2136_v20 = vpop.f32.mrb[42].mxu1  ;;  %v2025_v21 = vpop.f32.mrb[43].mxu0 }
 0x1a4   : > { %v2026_v22 = vadd.f32 %v2025_v21, %v2024_v17  ;;  %v2137_v23 = vpop.f32.mrb[43].mxu1 }
 0x1a5   : > { %1938 = vst [vmem:[%s2789_s9 + $0x48] sm:$0xff] %v1898_v18   ;;  %v1214_v24 = vadd.f32 %v2135_v19, %v2023_v15  ;;  %v2138_v25 = vadd.f32 %v2137_v23, %v2136_v20 }
 0x1a7   : > { %v1217_v26 = vadd.f32 %v2138_v25, %v2026_v22  ;;  %v1386_v28 = vadd.f32 %v2784_v45, %v1214_v24 }
 0x1a8   : > { %v2027_v27 = vpop.f32.mrb[44].mxu0 }
 0x1a9   : > { %v1387_v29 = vadd.f32 %v2784_v45, %v1217_v26  ;;  %v2139_v30 = vpop.f32.mrb[44].mxu1  ;;  %v2028_v31 = vpop.f32.mrb[45].mxu0 }
 0x1aa   : > { %v2029_v32 = vadd.f32 %v2028_v31, %v2027_v27  ;;  %v2140_v33 = vpop.f32.mrb[45].mxu1  ;;  %v2030_v34 = vpop.f32.mrb[46].mxu0 }
 0x1ab   : > { %v1903_v35 = vpack.c.bf16 %v1387_v29, %v1386_v28  ;;  %v2141_v36 = vadd.f32 %v2140_v33, %v2139_v30  ;;  %v2142_v37 = vpop.f32.mrb[46].mxu1  ;;  %v2031_v38 = vpop.f32.mrb[47].mxu0 }
 0x1ac   : > { %v2032_v39 = vadd.f32 %v2031_v38, %v2030_v34  ;;  %v2143_v40 = vpop.f32.mrb[47].mxu1 }
 0x1ad   : > { %1939 = vst [vmem:[%s2789_s9 + $0x50] sm:$0xff] %v1903_v35   ;;  %v1222_v41 = vadd.f32 %v2141_v36, %v2029_v32  ;;  %v2144_v42 = vadd.f32 %v2143_v40, %v2142_v37 }
 0x1af   : > { %v1225_v43 = vadd.f32 %v2144_v42, %v2032_v39  ;;  %v1388_v46 = vadd.f32 %v2784_v45, %v1222_v41 }
 0x1b0   : > { %v2033_v44 = vpop.f32.mrb[48].mxu0 }
 0x1b1   : > { %v1389_v47 = vadd.f32 %v2784_v45, %v1225_v43  ;;  %v2145_v48 = vpop.f32.mrb[48].mxu1  ;;  %v2034_v49 = vpop.f32.mrb[49].mxu0 }
 0x1b2   : > { %v2035_v50 = vadd.f32 %v2034_v49, %v2033_v44  ;;  %v2146_v51 = vpop.f32.mrb[49].mxu1  ;;  %v2036_v52 = vpop.f32.mrb[50].mxu0 }
 0x1b3   : > { %v1908_v53 = vpack.c.bf16 %v1389_v47, %v1388_v46  ;;  %v2147_v54 = vadd.f32 %v2146_v51, %v2145_v48  ;;  %v2148_v55 = vpop.f32.mrb[50].mxu1  ;;  %v2037_v56 = vpop.f32.mrb[51].mxu0 }
 0x1b4   : > { %v2038_v57 = vadd.f32 %v2037_v56, %v2036_v52  ;;  %v2149_v58 = vpop.f32.mrb[51].mxu1 }
 0x1b5   : > { %1940 = vst [vmem:[%s2789_s9 + $0x58] sm:$0xff] %v1908_v53   ;;  %v1230_v59 = vadd.f32 %v2147_v54, %v2035_v50  ;;  %v2150_v60 = vadd.f32 %v2149_v58, %v2148_v55 }
 0x1b7   : > { %v1233_v61 = vadd.f32 %v2150_v60, %v2038_v57  ;;  %v1390_v63 = vadd.f32 %v2784_v45, %v1230_v59 }
 0x1b8   : > { %v2039_v62 = vpop.f32.mrb[52].mxu0 }
 0x1b9   : > { %v1391_v0 = vadd.f32 %v2784_v45, %v1233_v61  ;;  %v2151_v1 = vpop.f32.mrb[52].mxu1  ;;  %v2040_v2 = vpop.f32.mrb[53].mxu0 }
 0x1ba   : > { %v2041_v3 = vadd.f32 %v2040_v2, %v2039_v62  ;;  %v2152_v4 = vpop.f32.mrb[53].mxu1  ;;  %v2042_v5 = vpop.f32.mrb[54].mxu0 }
 0x1bb   : > { %v1913_v6 = vpack.c.bf16 %v1391_v0, %v1390_v63  ;;  %v2153_v7 = vadd.f32 %v2152_v4, %v2151_v1  ;;  %v2154_v8 = vpop.f32.mrb[54].mxu1  ;;  %v2043_v9 = vpop.f32.mrb[55].mxu0 }
 0x1bc   : > { %v2044_v10 = vadd.f32 %v2043_v9, %v2042_v5  ;;  %v2155_v11 = vpop.f32.mrb[55].mxu1 }
 0x1bd   : > { %1941 = vst [vmem:[%s2789_s9 + $0x60] sm:$0xff] %v1913_v6   ;;  %v1238_v12 = vadd.f32 %v2153_v7, %v2041_v3  ;;  %v2156_v13 = vadd.f32 %v2155_v11, %v2154_v8 }
 0x1bf   : > { %v1241_v14 = vadd.f32 %v2156_v13, %v2044_v10  ;;  %v1392_v16 = vadd.f32 %v2784_v45, %v1238_v12 }
 0x1c0   : > { %v2045_v15 = vpop.f32.mrb[56].mxu0 }
 0x1c1   : > { %v1393_v17 = vadd.f32 %v2784_v45, %v1241_v14  ;;  %v2157_v18 = vpop.f32.mrb[56].mxu1  ;;  %v2046_v19 = vpop.f32.mrb[57].mxu0 }
 0x1c2   : > { %v2047_v20 = vadd.f32 %v2046_v19, %v2045_v15  ;;  %v2158_v21 = vpop.f32.mrb[57].mxu1  ;;  %v2048_v22 = vpop.f32.mrb[58].mxu0 }
 0x1c3   : > { %v1918_v23 = vpack.c.bf16 %v1393_v17, %v1392_v16  ;;  %v2159_v24 = vadd.f32 %v2158_v21, %v2157_v18  ;;  %v2160_v25 = vpop.f32.mrb[58].mxu1  ;;  %v2049_v26 = vpop.f32.mrb[59].mxu0 }
 0x1c4   : > { %v2050_v27 = vadd.f32 %v2049_v26, %v2048_v22  ;;  %v2161_v28 = vpop.f32.mrb[59].mxu1 }
 0x1c5   : > { %1942 = vst [vmem:[%s2789_s9 + $0x68] sm:$0xff] %v1918_v23   ;;  %v1246_v29 = vadd.f32 %v2159_v24, %v2047_v20  ;;  %v2162_v30 = vadd.f32 %v2161_v28, %v2160_v25 }
 0x1c7   : > { %v1249_v31 = vadd.f32 %v2162_v30, %v2050_v27  ;;  %v1394_v33 = vadd.f32 %v2784_v45, %v1246_v29 }
 0x1c8   : > { %v2051_v32 = vpop.f32.mrb[60].mxu0 }
 0x1c9   : > { %v1395_v34 = vadd.f32 %v2784_v45, %v1249_v31  ;;  %v2163_v35 = vpop.f32.mrb[60].mxu1  ;;  %v2052_v36 = vpop.f32.mrb[61].mxu0 }
 0x1ca   : > { %v2053_v37 = vadd.f32 %v2052_v36, %v2051_v32  ;;  %v2164_v38 = vpop.f32.mrb[61].mxu1  ;;  %v2054_v39 = vpop.f32.mrb[62].mxu0 }
 0x1cb   : > { %v1923_v40 = vpack.c.bf16 %v1395_v34, %v1394_v33  ;;  %v2165_v41 = vadd.f32 %v2164_v38, %v2163_v35  ;;  %v2166_v42 = vpop.f32.mrb[62].mxu1  ;;  %v2055_v43 = vpop.f32.mrb[63].mxu0 }
 0x1cc   : > { %v2056_v44 = vadd.f32 %v2055_v43, %v2054_v39  ;;  %v2167_v46 = vpop.f32.mrb[63].mxu1 }
 0x1cd   : > { %1943 = vst [vmem:[%s2789_s9 + $0x70] sm:$0xff] %v1923_v40   ;;  %v1254_v47 = vadd.f32 %v2165_v41, %v2053_v37  ;;  %v2168_v48 = vadd.f32 %v2167_v46, %v2166_v42 }
 0x1cf   : > { %v1257_v49 = vadd.f32 %v2168_v48, %v2056_v44  ;;  %v1396_v50 = vadd.f32 %v2784_v45, %v1254_v47 }
 0x1d1   : > { %v1397_v51 = vadd.f32 %v2784_v45, %v1257_v49 }
 0x1d3   : > { %v1928_v52 = vpack.c.bf16 %v1397_v51, %v1396_v50 }
 0x1d5   : > { %1944 = vst [vmem:[%s2789_s9 + $0x78] sm:$0xff] %v1928_v52  }
 0x1d6   : > { %2447 = shalt.err (!%p2444_p5)
}
 0x1d7   : > { %s2448_s29 = scalar_lea.hbm %s2841_s7, 2048  ;;  %s2452_s20 = scalar_lea.hbm %s2896_s3, 4096 }
 0x1d8   : > { %p2449_p9 = scmp.ne.s32.totalorder %s2841_s7, %s2448_s29  ;;  %p2453_p3 = scmp.lt.u32.totalorder %s2841_s7, %s2896_s3 }
 0x1d9   : > { %p2454_p7 = scmp.lt.u32.totalorder %s2452_s20, %s2448_s29  ;;  %p2456_p4 = scmp.lt.u32.totalorder %s2448_s29, %s2841_s7 }
 0x1da   : > { %p2450_p1 = pnand %p2449_p9, %p2647_p10 }
 0x1db   : > { %p2455_p13 = por %p2454_p7, %p2453_p3 }
 0x1dc   : > { %p2451_p2 = pneg %p2450_p1 }
 0x1dd   : > { %p2457_p6 = por %p2456_p4, %p2455_p13 }
 0x1df   : > { %p2458_p8 = pnand %p2457_p6, %p2451_p2 }
 0x1e1   : > { %2461 = shalt.err (!%p2458_p8)
}
 0x1e2   : > { %s2529_s9 = smov 64   ;;  %s2530_s10 = smov 4  }
 0x1e3   : > { %2175 = dma.vmem_to_hbm [thread:$0]  (%p2647_p10), %s2843_s11, 2048, %s2841_s7, %s1559_s8, %s2529_s9, %s2529_s9, %s2530_s10  }
 0x1e4 PF: > { %s1587_s18 = sand.u32 1, %s2500_s12   ;;  %p2914_p12 = scmp.ne.s32.totalorder %s2904_s23, 0 }
 0x1e5   : > { %p2915_p11 = scmp.ge.s32.totalorder %s2520_s17, 2  ;;  %s1588_s26 = scalar_lea.sflag [#allocation5], %s1587_s18 }
 0x1e7   : > { %p2186_p0 = pnand %p2915_p11, %p2914_p12 }
 0x1e9   : > { %2495 = dma.done.wait (!%p2186_p0), %s1588_s26, 2048  }
 0x1ea   : > { %2497 = vsyncadd (!%p2186_p0), %s1588_s26, 4294965248  ;;  %s20_s17 = sadd.s32 1, %s2520_s17   ;;  %s2916_s12 = smov %s2504_s13 }
 0x1eb   : > { %p17_p5 = scmp.ge.s32.totalorder %s20_s17, 4   ;;  %s2917_s13 = smov %s2508_s14 }
 0x1ec   : > { %s2918_s14 = smov %s2656_s5  ;;  %s2919_s15 = smov %s2516_s16 }
 0x1ed   : > { %s2920_s16 = smov %s2922_s28  ;;  %19 = sbr.rel (!%p17_p5) target bundleno = 7 (0x7), region = 90 }
 0x1f4   :  { %1593 = vsyncpa [#allocation4], 1 }
 0x1f5   :  { %1595 = vsyncpa [#allocation4 + $0x1], 1 }
 0x1f6   :  { %1596 = vsyncpa [#allocation7], 1 }
 0x1f7   :  { %1597 = vsyncpa [#allocation5], 1 }
 0x1f8   :  { %1599 = vsyncpa [#allocation5 + $0x1], 1 }

</bundles_post_ra>
